<compile_context>
chip_gen: v5e
topology: v5e:2x2
jax: 0.10.0
libtpu: 0.0.40
codegen_flags: <defaults>
</compile_context>

<pallas_src>
import functools

import jax
import jax.numpy as jnp
from jax.experimental import pallas as pl
from jax.experimental.pallas import tpu as pltpu


def _round_up(x, m):
    return ((x + m - 1) // m) * m


def _round_down(x, m):
    return (x // m) * m


# ---------------------------------------------------------------------------
# Kernels
# ---------------------------------------------------------------------------

def _layernorm(x, eps):
    # Single data pass (one sum + one sum-of-squares reduction); affine (gamma/beta) is
    # folded into the linear weights outside the kernel.
    inv_d = 1.0 / x.shape[-1]
    mean = jnp.sum(x, axis=-1, keepdims=True) * inv_d
    var = jnp.sum(x * x, axis=-1, keepdims=True) * inv_d - mean * mean
    return (x - mean) * jax.lax.rsqrt(var + eps)


def _fused_kernel(x_ref, w_ref, b_ref, o_ref, *, with_norm, eps, compute_dtype):
    """Shared-input path: one MXU matmul covering all heads for this (bm, tn) tile.

    x_ref: (bm, D) input tile; w_ref: (D, tn) fused/padded weights (gamma folded);
    b_ref: (1, tn) fused/padded bias (beta folded); o_ref: (bm, tn) logits tile.
    """
    if with_norm:
        x = _layernorm(x_ref[...].astype(jnp.float32), eps).astype(compute_dtype)
    else:
        x = x_ref[...].astype(compute_dtype)            # no f32 round-trip when no LN
    acc = jnp.dot(x, w_ref[...], preferred_element_type=jnp.float32)
    o_ref[...] = (acc + b_ref[...]).astype(o_ref.dtype)


def _expand_kernel(x_ref, w_ref, b_ref, o_ref, *, with_norm, eps, compute_dtype,
                   zero_fill):
    """feat_expand path: per-head inputs, per-head stores into the fused (bm, N_pad) slab.

    x_ref: (H, bm, D); w_ref: (H, D, C) (gamma folded); b_ref: (H, C) (beta folded);
    o_ref: (bm, N_pad) logits tile (concatenated head layout, lane-padded).
    """
    num_heads, _, c = w_ref.shape
    if zero_fill:                                        # cover the lane-padding columns
        o_ref[...] = jnp.zeros_like(o_ref)
    for h in range(num_heads):                           # static unroll over heads
        xh = x_ref[h]
        if with_norm:
            xh = _layernorm(xh.astype(jnp.float32), eps).astype(compute_dtype)
        else:
            xh = xh.astype(compute_dtype)
        acc = jnp.dot(xh, w_ref[h], preferred_element_type=jnp.float32)   # (bm, C)
        # Direct per-head store at static column offsets: bounds live ranges (no in-kernel
        # concatenate / spills).  HBM writeback is still the full lane-dense slab.
        o_ref[:, h * c:(h + 1) * c] = (acc + b_ref[h:h + 1, :]).astype(o_ref.dtype)


# ---------------------------------------------------------------------------
# Parameter preprocessing (hoistable / cacheable)
# ---------------------------------------------------------------------------

def prepare_fused_params(weights, biases, gammas=None, betas=None, *,
                         with_norm=False, feat_expand=False,
                         compute_dtype=jnp.bfloat16):
    """Fold the per-head LayerNorm affine into the linear and lay the weights out for the
    kernel.  This is a full HBM pass over the weights — call it once per parameter update
    (e.g. after `update()`), cache the result, and pass it via `fused_params=` so repeated
    forward calls skip it.

    weights: (H, D, C)  per-head torch nn.Linear weight, transposed to (D, C)
    biases:  (H, C)
    gammas/betas: (H, D)  LayerNorm affine (only used when with_norm)
    """
    num_heads, embed_dim, nb_classes = weights.shape
    if with_norm:
        w_eff = weights * gammas[:, :, None]                         # (H, D, C)
        b_eff = biases + jnp.einsum('hd,hdc->hc', betas, weights)    # (H, C)
    else:
        w_eff, b_eff = weights, biases

    n_valid = num_heads * nb_classes
    n_pad = _round_up(n_valid, 128)          # lane-dense output slab (unmasked stores)

    if feat_expand:
        w = w_eff.astype(compute_dtype)                              # (H, D, C)
        b = b_eff.astype(jnp.float32)                                # (H, C)
    else:
        # Fuse heads into the matmul N dim (matches torch cat(dim=1) ordering), then
        # zero-pad the fused columns up to a multiple of 128 lanes.
        w = jnp.transpose(w_eff, (1, 0, 2)).reshape(embed_dim, n_valid)
        w = jnp.pad(w, ((0, 0), (0, n_pad - n_valid))).astype(compute_dtype)
        b = jnp.pad(b_eff.reshape(1, n_valid),
                    ((0, 0), (0, n_pad - n_valid))).astype(jnp.float32)

    return dict(w=w, b=b, num_heads=num_heads, embed_dim=embed_dim,
                nb_classes=nb_classes, n_valid=n_valid, n_pad=n_pad,
                feat_expand=feat_expand, with_norm=with_norm,
                compute_dtype=compute_dtype)


# ---------------------------------------------------------------------------
# Tile selection (VMEM-accounted)
# ---------------------------------------------------------------------------

def _choose_bm(batch, bytes_per_row, fixed_bytes, vmem_budget):
    """Batch-tile rows: fit the budget, multiple of 8 (256-preferred when large), and keep
    the batch grid axis >= 2 tiles once B >= 128 (pipelining + v7x's two TensorCores only
    help on a 'parallel' axis with more than one step)."""
    cap = (vmem_budget - fixed_bytes) // max(bytes_per_row, 1)
    cap = int(max(8, min(1024, _round_down(cap, 8))))
    if batch <= 128 and batch <= cap:
        return batch                          # single full-dim tile — always legal
    bm = min(cap, _round_up(pl.cdiv(batch, 2), 8))
    if bm >= 512:
        bm = _round_down(bm, 256)             # 256-aligned M tiles fill the v6e/v7x MXU
    return max(8, _round_down(bm, 8))


def _choose_tn(n_pad, embed_dim, compute_bytes, w_budget):
    """Fused-head column tile: bound the weight slab so realistic D x (H*C) configs never
    blow VMEM (matters most on v7x's 64 MiB per-TC VMEM)."""
    if embed_dim * n_pad * compute_bytes <= w_budget:
        return n_pad                          # whole fused N resident (single-buffered)
    tn = _round_down(w_budget // (embed_dim * compute_bytes), 256)
    return int(min(n_pad, max(256, tn)))


# ---------------------------------------------------------------------------
# Forward
# ---------------------------------------------------------------------------

def simple_continual_linear_forward(x, weights=None, biases=None, gammas=None,
                                    betas=None, *, feat_expand=False, with_norm=False,
                                    eps=1e-5, compute_dtype=jnp.bfloat16,
                                    out_dtype=jnp.float32, fused_params=None,
                                    vmem_budget_bytes=24 * 2 ** 20,
                                    vmem_limit_bytes=None):
    """Pallas forward for SimpleContinualLinear.

    x: (B, D) if not feat_expand; (H, B, D) if feat_expand (per-head features, x[ti]).
    Either pass raw params (fused per call) or a cached dict from prepare_fused_params
    via `fused_params=` (preferred for repeated forwards).
    Returns {'logits': (B, H*C)} in torch's cat(dim=1) layout.
    """
    if fused_params is None:
        fused_params = prepare_fused_params(
            weights, biases, gammas, betas, with_norm=with_norm,
            feat_expand=feat_expand, compute_dtype=compute_dtype)
    fp = fused_params
    num_heads, embed_dim = fp['num_heads'], fp['embed_dim']
    nb_classes, n_valid, n_pad = fp['nb_classes'], fp['n_valid'], fp['n_pad']
    w, b = fp['w'], fp['b']
    compute_dtype = fp['compute_dtype']
    with_norm = fp['with_norm']
    feat_expand = fp['feat_expand']

    cbytes = jnp.dtype(compute_dtype).itemsize
    xbytes = jnp.dtype(x.dtype).itemsize
    obytes = jnp.dtype(out_dtype).itemsize

    if feat_expand:
        assert x.shape[0] == num_heads and x.shape[2] == embed_dim
        batch = x.shape[1]
        # Resident (single-buffered) per-head weights + bias; x tile scales with H, so the
        # batch tile is derated accordingly in the accounting below.
        fixed = num_heads * embed_dim * nb_classes * cbytes + num_heads * nb_classes * 4
        per_row = 2 * (num_heads * embed_dim * xbytes) + 2 * (n_pad * obytes)
        bm = _choose_bm(batch, per_row, fixed, vmem_budget_bytes)
        grid = (pl.cdiv(batch, bm),)
        kernel = functools.partial(_expand_kernel, with_norm=with_norm, eps=eps,
                                   compute_dtype=compute_dtype,
                                   zero_fill=(n_pad != n_valid))
        in_specs = [
            pl.BlockSpec((num_heads, bm, embed_dim), lambda i: (0, i, 0)),
            pl.BlockSpec((num_heads, embed_dim, nb_classes), lambda i: (0, 0, 0),
                         pipeline_mode=pl.Buffered(1)),          # constant -> 1 buffer
            pl.BlockSpec((num_heads, nb_classes), lambda i: (0, 0),
                         pipeline_mode=pl.Buffered(1)),
        ]
        out_spec = pl.BlockSpec((bm, n_pad), lambda i: (i, 0))
        semantics = ("parallel",)
        # TODO(synk): very large H*D*C in feat_expand mode would also want an N/head grid
        # axis; not needed at these shapes.
    else:
        assert x.shape[1] == embed_dim
        batch = x.shape[0]
        tn = _choose_tn(n_pad, embed_dim, cbytes, w_budget=vmem_budget_bytes // 3)
        nn = pl.cdiv(n_pad, tn)
        w_bufs = 1 if nn == 1 else 2
        fixed = w_bufs * (embed_dim * tn * cbytes + tn * 4)
        per_row = 2 * (embed_dim * xbytes) + 2 * (tn * obytes)
        bm = _choose_bm(batch, per_row, fixed, vmem_budget_bytes)
        grid = (pl.cdiv(batch, bm), nn)
        kernel = functools.partial(_fused_kernel, with_norm=with_norm, eps=eps,
                                   compute_dtype=compute_dtype)
        if nn == 1:
            # W / bias constant across the whole grid: single-buffer them (halves the
            # dominant VMEM resident vs. the default double-buffering).
            w_spec = pl.BlockSpec((embed_dim, tn), lambda i, j: (0, j),
                                  pipeline_mode=pl.Buffered(1))
            b_spec = pl.BlockSpec((1, tn), lambda i, j: (0, j),
                                  pipeline_mode=pl.Buffered(1))
        else:
            w_spec = pl.BlockSpec((embed_dim, tn), lambda i, j: (0, j))
            b_spec = pl.BlockSpec((1, tn), lambda i, j: (0, j))
        in_specs = [
            pl.BlockSpec((bm, embed_dim), lambda i, j: (i, 0)),   # re-DMA'd only when i moves
            w_spec,
            b_spec,
        ]
        out_spec = pl.BlockSpec((bm, tn), lambda i, j: (i, j))
        semantics = ("parallel", "parallel")

    out = pl.pallas_call(
        kernel,
        out_shape=jax.ShapeDtypeStruct((batch, n_pad), out_dtype),
        grid_spec=pltpu.PrefetchScalarGridSpec(
            num_scalar_prefetch=0,
            grid=grid,
            in_specs=in_specs,
            out_specs=out_spec),
        compiler_params=pltpu.CompilerParams(
            dimension_semantics=semantics,
            vmem_limit_bytes=vmem_limit_bytes),
    )(x, w, b)

    logits = out if n_pad == n_valid else out[:, :n_valid]
    return {"logits": logits}


# ---------------------------------------------------------------------------
# Reference + init helpers (test only)
# ---------------------------------------------------------------------------

def _trunc_normal(key, shape, std=0.02):
    # timm-style trunc_normal_: normal(0, std) truncated to +-2*std.
    return jnp.clip(std * jax.random.truncated_normal(key, -2.0 / std, 2.0 / std, shape,
                                                      dtype=jnp.float32), -2.0, 2.0)


def _reference_forward(x, weights, biases, gammas, betas, feat_expand, with_norm, eps=1e-5):
    outs = []
    num_heads = weights.shape[0]
    for h in range(num_heads):
        inp = x[h] if feat_expand else x
        if with_norm:
            mean = jnp.mean(inp, axis=-1, keepdims=True)
            var = jnp.mean((inp - mean) ** 2, axis=-1, keepdims=True)
            inp = (inp - mean) * jax.lax.rsqrt(var + eps) * gammas[h] + betas[h]
        outs.append(inp @ weights[h] + biases[h])
    return jnp.concatenate(outs, axis=1)


if __name__ == "__main__":
    # Module config: embed_dim=32, nb_classes=16 per head, 2 heads (initial + one update()).
    B, D, C, H = 8, 32, 16, 2
    key = jax.random.PRNGKey(0)
    kx, kxe, *kws = jax.random.split(key, 2 + H)

    x = jax.random.normal(kx, (B, D), dtype=jnp.float32)
    x_exp = jax.random.normal(kxe, (H, B, D), dtype=jnp.float32)

    # torch nn.Linear weight is (C, D); store transposed (D, C) per head for x @ W.
    weights = jnp.stack([_trunc_normal(kws[h], (C, D)).T for h in range(H)], axis=0)  # (H,D,C)
    biases = jnp.zeros((H, C), dtype=jnp.float32)
    # Non-default LayerNorm affine values to exercise the gamma/beta fold.
    gammas = 1.0 + 0.1 * jax.random.normal(jax.random.PRNGKey(2), (H, D), dtype=jnp.float32)
    betas = 0.05 * jax.random.normal(jax.random.PRNGKey(3), (H, D), dtype=jnp.float32)

    ok = True

    # f32-operand path: tight check against the pure-JAX reference.
    for feat_expand, with_norm in ((False, False), (False, True), (True, False), (True, True)):
        xin = x_exp if feat_expand else x
        out = simple_continual_linear_forward(
            xin, weights, biases, gammas, betas,
            feat_expand=feat_expand, with_norm=with_norm,
            compute_dtype=jnp.float32)
        logits = jax.block_until_ready(out["logits"])
        ref = _reference_forward(xin, weights, biases, gammas, betas, feat_expand, with_norm)
        ok = ok and logits.shape == (B, H * C)
        ok = ok and bool(jnp.allclose(logits, ref, atol=1e-3, rtol=1e-3))

    # Default bf16-operand / f32-accumulate path, exercising the cached fused_params API.
    fused = prepare_fused_params(weights, biases, gammas, betas, with_norm=True,
                                 feat_expand=False, compute_dtype=jnp.bfloat16)
    out = simple_continual_linear_forward(x, fused_params=fused)
    logits = jax.block_until_ready(out["logits"])
    ref = _reference_forward(x, weights, biases, gammas, betas, False, True)
    ok = ok and bool(jnp.allclose(logits, ref, atol=2e-2, rtol=2e-2))

    # TODO(synk): backup()/recall()/update() are host-side parameter management (deepcopy of
    # state, appending heads); they have no kernel equivalent and are handled outside.
    assert ok, "Pallas SimpleContinualLinear mismatch vs reference"
    print("KERNEL_OK")
</pallas_src>

<mosaic_0001>
module attributes {stable_mosaic.version = 11 : i64} {
  func.func @_fused_kernel(%arg0: i32, %arg1: i32, %arg2: memref<8x32xf32, #tpu.memory_space<vmem>>, %arg3: memref<32x128xf32, #tpu.memory_space<vmem>>, %arg4: memref<1x128xf32, #tpu.memory_space<vmem>>, %arg5: memref<8x128xf32, #tpu.memory_space<vmem>>) attributes {dimension_semantics = [#tpu.dimension_semantics<parallel>, #tpu.dimension_semantics<parallel>], iteration_bounds = array<i64: 1, 1>, scalar_prefetch = 0 : i64, scratch_operands = 0 : i64, tpu.core_type = #tpu.core_type<tc>, window_params = [{transform_indices = @transform_0, window_bounds = array<i64: 8, 32>}, {pipeline_mode = #tpu.pipeline_mode<synchronous>, transform_indices = @transform_1, window_bounds = array<i64: 32, 128>}, {pipeline_mode = #tpu.pipeline_mode<synchronous>, transform_indices = @transform_2, window_bounds = array<i64: 1, 128>}, {transform_indices = @transform_3, window_bounds = array<i64: 8, 128>}]} {
    %c0 = arith.constant 0 : index
    %c0_0 = arith.constant 0 : index
    %0 = vector.load %arg2[%c0, %c0_0] : memref<8x32xf32, #tpu.memory_space<vmem>>, vector<8x32xf32>
    %c0_1 = arith.constant 0 : index
    %c0_2 = arith.constant 0 : index
    %1 = vector.load %arg3[%c0_1, %c0_2] : memref<32x128xf32, #tpu.memory_space<vmem>>, vector<32x128xf32>
    %cst = arith.constant dense<0.000000e+00> : vector<8x128xf32>
    %2 = tpu.matmul %0, %1, %cst {dimension_numbers = #tpu.dot_dimension_numbers<[1], [0], [0], [1], [0, 0, 1, 1], [], []>} : vector<8x32xf32>, vector<32x128xf32>, vector<8x128xf32> -> vector<8x128xf32>
    %c0_3 = arith.constant 0 : index
    %c0_4 = arith.constant 0 : index
    %3 = vector.load %arg4[%c0_3, %c0_4] : memref<1x128xf32, #tpu.memory_space<vmem>>, vector<1x128xf32>
    %4 = vector.broadcast %3 : vector<1x128xf32> to vector<8x128xf32>
    %5 = arith.addf %2, %4 : vector<8x128xf32>
    %c0_5 = arith.constant 0 : index
    %c0_6 = arith.constant 0 : index
    %6 = vector.load %arg5[%c0_5, %c0_6] : memref<8x128xf32, #tpu.memory_space<vmem>>, vector<8x128xf32>
    tpu.vector_store %arg5[%c0_5, %c0_6], %5 {strides = array<i32>} : memref<8x128xf32, #tpu.memory_space<vmem>>, vector<8x128xf32>,
    return
  }
  func.func @transform_0(%arg0: i32, %arg1: i32) -> (i32, i32) {
    %c0_i32 = arith.constant 0 : i32
    %c0_i32_0 = arith.constant 0 : i32
    return %arg0, %c0_i32 : i32, i32
  }
  func.func @transform_1(%arg0: i32, %arg1: i32) -> (i32, i32) {
    %c0_i32 = arith.constant 0 : i32
    %c0_i32_0 = arith.constant 0 : i32
    return %c0_i32, %arg1 : i32, i32
  }
  func.func @transform_2(%arg0: i32, %arg1: i32) -> (i32, i32) {
    %c0_i32 = arith.constant 0 : i32
    %c0_i32_0 = arith.constant 0 : i32
    return %c0_i32, %arg1 : i32, i32
  }
  func.func @transform_3(%arg0: i32, %arg1: i32) -> (i32, i32) {
    %c0_i32 = arith.constant 0 : i32
    return %arg0, %arg1 : i32, i32
  }
}

</mosaic_0001>

<bundles_post_ra>
// kernel: tpu_custom_call.1
= control target key start
LH: loop header
LB: loop body
LE: loop exit
PB: predicated region body
PF: predicated region fallthrough
CT: control target
= control target key end

     0   :  { %8 = vsyncpa [#allocation3], 0  ;;  %s219_s0 = inlined_call_operand.hbm [shape: f32[8,32], index: 0, kind: input, shape index: {}]   ;;  %s220_s1 = inlined_call_operand.hbm [shape: f32[32,128], index: 1, kind: input, shape index: {}]   ;;  %s221_s2 = inlined_call_operand.vmem [shape: f32[1,128], index: 2, kind: input, shape index: {}]   ;;  %s222_s3 = inlined_call_operand.hbm [shape: f32[8,128], index: 3, kind: output, shape index: {}]  }
   0x1   :  { %9 = vsyncpa [#allocation6], 0 }
   0x2   :  { %10 = vsyncpa [#allocation4], 0  ;;  %s16_s14 = sshll.u32 %s219_s0, 4  ;;  %s182_s15 = smov [#allocation2]   ;;  %s17_s14 = int_to_ptr.hbm [resolvable:$true] %s16_s14 }
   0x3   :  { %s18_s16 = sshll.u32 %s182_s15, 4  ;;  %s26_s19 = sshll.u32 %s220_s1, 4  ;;  %s19_s16 = int_to_ptr.vmem [resolvable:$true] %s18_s16  ;;  %s27_s19 = int_to_ptr.hbm [resolvable:$true] %s26_s19 }
   0x4   :  { %21 = dma.hbm_to_vmem [thread:$0]  %s17_s14, 128, %s19_s16, [#allocation3]  }
   0x5   :  { %s183_s20 = smov [#allocation5]   ;;  %s184_s22 = smov 128  }
   0x6   :  { %s28_s21 = sshll.u32 %s183_s20, 4  ;;  %s185_s23 = smov 8   ;;  %s29_s21 = int_to_ptr.vmem [resolvable:$true] %s28_s21 }
   0x7   :  { %34 = dma.hbm_to_vmem [thread:$0]  %s27_s19, 512, %s29_s21, [#allocation6], %s184_s22, %s184_s22, %s185_s23  }
   0x8   :  { %176 = dma.done.wait [#allocation3], 128  }
   0x9   :  { %177 = vsyncadd [#allocation3], 4294967168 }
   0xa   :  { %178 = dma.done.wait [#allocation6], 512  }
   0xb   :  { %179 = vsyncadd [#allocation6], 4294966784  ;;  %v49_v0 = vld [vmem:[#allocation5 + $0x18] sm:$0xff]  ;;  %v48_v1 = vld [vmem:[#allocation5 + $0x10] sm:$0xff]  ;;  %vm54_vm0 = vcmask 261120   ;;  %s186_s24 = smov [#allocation7]  }
   0xc   :  { %70 = vmatpush.msra.mxu0 %v49_v0  ;;  %v47_v2 = vld [vmem:[#allocation5 + $0x8] sm:$0xff]  ;;  %v46_v3 = vld [vmem:[#allocation5] sm:$0xff]  ;;  %v45_v4 = vld [vmem:[#allocation2] sm:$0xff]  ;;  %s84_s25 = sshll.u32 %s186_s24, 4  ;;  %s86_s28 = sshll.u32 %s222_s3, 4  ;;  %s85_s25 = int_to_ptr.vmem [resolvable:$true] %s84_s25  ;;  %s87_s28 = int_to_ptr.hbm [resolvable:$true] %s86_s28 }
   0xd   :  { %v103_v5 = vld [vmem:[%s221_s2] ss:$0 sm:$0xff] }
   0xe   :  { %71 = vmatpush.msra.mxu0 %v48_v1 }
  0x10   :  { %72 = vmatpush.msra.mxu0 %v47_v2 }
  0x12   :  { %73 = vmatpush.msra.mxu0 %v46_v3 }
  0x13   :  { %97 = vmatmul.msk.f32.vlgmr.msra.gmra.mxu0 %vm54_vm0, %v45_v4 }
  0x90   :  { %v75_v6 = vpop.f32.mrf.mxu0 }
  0x91   :  { %v76_v7 = vadd.f32 %v103_v5, %v75_v6 }
  0x93   :  { %78 = vst [vmem:[#allocation7] sm:$0xff] %v76_v7 }
  0x94   :  { %89 = dma.vmem_to_hbm [thread:$0]  %s85_s25, 128, %s87_s28, [#allocation4]  }
  0x95   :  { %180 = dma.done.wait [#allocation4], 128  }
  0x96   :  { %181 = vsyncadd [#allocation4], 4294967168 }
  0x97   :  { %94 = vsyncpa [#allocation3], 1 }
  0x98   :  { %95 = vsyncpa [#allocation6], 1 }
  0x99   :  { %96 = vsyncpa [#allocation4], 1 }

</bundles_post_ra>
